<compile_context>
chip_gen: v7x
topology: tpu7x:2x2x1
jax: 0.10.0
libtpu: 0.0.40
codegen_flags: <defaults>
</compile_context>

<pallas_src>
import functools

import jax
import jax.numpy as jnp
from jax import lax
from jax.experimental import pallas as pl
from jax.experimental.pallas import tpu as pltpu

LANES = 128
MAX_BLOCK_ROWS = 4096  # 4096 x 128 x 4B = 2 MiB per f32 input tile


def _focal_kernel(x_ref, t_ref, o_ref, acc_ref, *, gamma, full_rows,
                  rem_lanes, block_rows, acc_rows, inner_blocks):
    p = pl.program_id(0)
    i = pl.program_id(1)

    @pl.when(i == 0)
    def _init():
        acc_ref[...] = jnp.zeros_like(acc_ref)

    x = x_ref[...].astype(jnp.float32)
    t = t_ref[...].astype(jnp.float32)

    # Numerically-stable BCE-with-logits (== F.binary_cross_entropy_with_logits,
    # reduction='none'):  bce = max(x, 0) - x*t + log1p(exp(-|x|))
    bce = jnp.maximum(x, 0.0) - x * t + jnp.log1p(jnp.exp(-jnp.abs(x)))
    pt = jnp.exp(-bce)
    one_m_pt = 1.0 - pt

    # (1 - pt) ** gamma: multiply chain for small integer gamma (default 2)
    # avoids the exp/log pair of a float pow on the EUP.
    if float(gamma).is_integer() and 0 <= int(gamma) <= 8:
        gi = int(gamma)
        w = jnp.ones_like(pt) if gi == 0 else one_m_pt
        for _ in range(max(gi - 1, 0)):
            w = w * one_m_pt
    else:
        w = one_m_pt ** gamma

    focal = w * bce  # alpha is applied once, in the wrapper

    def _accum(v):
        if acc_rows == 8:
            # Pure vreg adds into the (8, 128) accumulator; no per-step XLU.
            acc_ref[...] += jnp.sum(v.reshape(block_rows // 8, 8, LANES), axis=0)
        else:
            acc_ref[...] += jnp.sum(v, axis=0, keepdims=True)

    lb = p * inner_blocks + i            # logical (UNclamped) block index
    row0 = lb * block_rows               # int32; rows (not elems) -> no overflow

    # Fast path: every row of this block is fully valid -> skip all masking.
    is_interior = row0 + block_rows <= full_rows

    @pl.when(is_interior)
    def _fast():
        _accum(focal)

    @pl.when(jnp.logical_not(is_interior))
    def _tail():
        row_iota = lax.broadcasted_iota(jnp.int32, (block_rows, LANES), 0)
        grow = row0 + row_iota
        if rem_lanes:
            lane_iota = lax.broadcasted_iota(jnp.int32, (block_rows, LANES), 1)
            mask = (grow < full_rows) | ((grow == full_rows) & (lane_iota < rem_lanes))
        else:
            mask = grow < full_rows
        # Select-based masking on the RESULT only: garbage / pad rows in the
        # partial (or duplicated) block contribute exactly zero and any
        # NaN/Inf they produce is dropped by the select.
        _accum(jnp.where(mask, focal, 0.0))

    @pl.when(i == inner_blocks - 1)
    def _finalize():
        o_ref[...] = acc_ref[...]


def binary_focal_loss(inputs, targets, alpha=1.0, gamma=2.0, size_average=True,
                      max_block_rows=MAX_BLOCK_ROWS):
    """Matches BinaryFocalLoss.forward for same-shaped logits / targets."""
    assert inputs.shape == targets.shape
    if targets.dtype == jnp.bool_:
        targets = targets.astype(jnp.int8)   # kernel upcasts to f32 in VMEM

    n_elem = inputs.size
    x = inputs.reshape(-1)
    t = targets.reshape(-1)

    rem_lanes = n_elem % LANES
    if rem_lanes:
        # Ragged sizes only: pad to the next 128-lane boundary (<=127 zeros);
        # validity is still enforced in-kernel against the original n_elem.
        pad = LANES - rem_lanes
        x = jnp.pad(x, (0, pad))
        t = jnp.pad(t, (0, pad))

    total_rows = x.size // LANES
    full_rows = n_elem // LANES            # rows whose 128 lanes are all valid

    if total_rows <= max_block_rows:
        block_rows = total_rows            # single block == full array dims
    else:
        block_rows = max_block_rows        # multiple of 32 -> ok for bf16/int8
    acc_rows = 8 if (block_rows % 8 == 0 and block_rows > 0) else 1

    row_blocks = pl.cdiv(total_rows, block_rows)
    # Leading parallel axis -> both TensorCores on v7x; harmless on v5e/v6e.
    num_parallel = 2 if row_blocks >= 2 else 1
    inner_blocks = pl.cdiv(row_blocks, num_parallel)

    x2 = x.reshape(total_rows, LANES)
    t2 = t.reshape(total_rows, LANES)

    def in_index_map(p_idx, i_idx):
        # Clamp so a duplicated tail block never DMAs out of range; the
        # in-kernel mask (computed from the UNclamped index) zeroes it.
        return (jnp.minimum(p_idx * inner_blocks + i_idx, row_blocks - 1), 0)

    kernel = functools.partial(
        _focal_kernel,
        gamma=float(gamma),
        full_rows=int(full_rows),
        rem_lanes=int(rem_lanes),
        block_rows=int(block_rows),
        acc_rows=int(acc_rows),
        inner_blocks=int(inner_blocks),
    )

    partials = pl.pallas_call(
        kernel,
        out_shape=jax.ShapeDtypeStruct((num_parallel * acc_rows, LANES), jnp.float32),
        grid_spec=pltpu.PrefetchScalarGridSpec(
            num_scalar_prefetch=0,
            grid=(num_parallel, inner_blocks),
            in_specs=[
                pl.BlockSpec((block_rows, LANES), in_index_map),
                pl.BlockSpec((block_rows, LANES), in_index_map),
            ],
            out_specs=pl.BlockSpec((acc_rows, LANES), lambda p, i: (p, 0)),
            scratch_shapes=[pltpu.VMEM((acc_rows, LANES), jnp.float32)],
        ),
        compiler_params=pltpu.CompilerParams(
            dimension_semantics=("parallel", "arbitrary"),
            vmem_limit_bytes=48 * 1024 * 1024,
        ),
    )(x2, t2)

    total = jnp.sum(partials)
    scale = float(alpha) / (float(n_elem) if size_average else 1.0)
    return total * scale


def _reference(inputs, targets, alpha=1.0, gamma=2.0, size_average=True):
    x = inputs.astype(jnp.float32)
    t = targets.astype(jnp.float32)
    bce = jnp.maximum(x, 0.0) - x * t + jnp.log1p(jnp.exp(-jnp.abs(x)))
    pt = jnp.exp(-bce)
    fl = alpha * (1.0 - pt) ** gamma * bce
    return fl.mean() if size_average else fl.sum()


if __name__ == "__main__":
    key = jax.random.PRNGKey(0)
    k1, k2, k3, k4, k5, k6 = jax.random.split(key, 6)

    # 1) NCHW logits + binary targets (numel % 128 == 0, single fast block).
    inputs = jax.random.normal(k1, (2, 4, 16, 16), dtype=jnp.float32)
    targets = (jax.random.uniform(k2, (2, 4, 16, 16)) > 0.5).astype(jnp.float32)
    loss = jax.block_until_ready(binary_focal_loss(inputs, targets))
    ref = _reference(inputs, targets)
    assert jnp.allclose(loss, ref, rtol=1e-5, atol=1e-6), (loss, ref)

    # 2) Ragged size (numel % 128 != 0) + sum reduction -> lane-tail masking.
    big_in = jax.random.normal(k3, (3, 5, 37, 41), dtype=jnp.float32)
    big_tg = (jax.random.uniform(k4, (3, 5, 37, 41)) > 0.5).astype(jnp.float32)
    loss2 = jax.block_until_ready(
        binary_focal_loss(big_in, big_tg, alpha=0.5, gamma=2.0,
                          size_average=False))
    ref2 = _reference(big_in, big_tg, alpha=0.5, gamma=2.0, size_average=False)
    assert jnp.allclose(loss2, ref2, rtol=1e-5, atol=1e-4), (loss2, ref2)

    # 3) Multi-block grid (interior fast blocks + partial tail block +
    #    clamped duplicate block on the parallel axis) via a small block size.
    mid_in = jax.random.normal(k5, (2, 4, 32, 33), dtype=jnp.float32)
    mid_tg = (jax.random.uniform(k6, (2, 4, 32, 33)) > 0.5).astype(jnp.float32)
    loss3 = jax.block_until_ready(
        binary_focal_loss(mid_in, mid_tg, alpha=1.0, gamma=3.0,
                          size_average=True, max_block_rows=16))
    ref3 = _reference(mid_in, mid_tg, alpha=1.0, gamma=3.0, size_average=True)
    assert jnp.allclose(loss3, ref3, rtol=1e-5, atol=1e-6), (loss3, ref3)

    # 4) Narrow-dtype logits (bf16) accepted directly; kernel upcasts in VMEM.
    bf_in = inputs.astype(jnp.bfloat16)
    loss4 = jax.block_until_ready(binary_focal_loss(bf_in, targets))
    ref4 = _reference(bf_in.astype(jnp.float32), targets)
    assert jnp.allclose(loss4, ref4, rtol=1e-4, atol=1e-5), (loss4, ref4)

    print("KERNEL_OK")
</pallas_src>

<mosaic_0001>
module attributes {stable_mosaic.version = 11 : i64} {
  func.func @_focal_kernel(%arg0: i32, %arg1: i32, %arg2: memref<16x128xf32, #tpu.memory_space<vmem>>, %arg3: memref<16x128xf32, #tpu.memory_space<vmem>>, %arg4: memref<8x128xf32, #tpu.memory_space<vmem>>, %arg5: memref<8x128xf32, #tpu.memory_space<vmem>>) attributes {dimension_semantics = [#tpu.dimension_semantics<parallel>, #tpu.dimension_semantics<arbitrary>], iteration_bounds = array<i64: 1, 1>, scalar_prefetch = 0 : i64, scratch_operands = 1 : i64, tpu.core_type = #tpu.core_type<tc>, window_params = [{transform_indices = @transform_0, window_bounds = array<i64: 16, 128>}, {transform_indices = @transform_1, window_bounds = array<i64: 16, 128>}, {transform_indices = @transform_2, window_bounds = array<i64: 8, 128>}]} {
    %c0_i32 = arith.constant 0 : i32
    %0 = arith.cmpi eq, %arg1, %c0_i32 : i32
    %1 = arith.extui %0 : i1 to i32
    %c0_i32_0 = arith.constant 0 : i32
    %2 = arith.cmpi ne, %1, %c0_i32_0 : i32
    scf.if %2 {
      %cst_13 = arith.constant 0.000000e+00 : f32
      %35 = vector.broadcast %cst_13 : f32 to vector<8x128xf32>
      %c0_14 = arith.constant 0 : index
      %c0_15 = arith.constant 0 : index
      %36 = vector.load %arg5[%c0_14, %c0_15] : memref<8x128xf32, #tpu.memory_space<vmem>>, vector<8x128xf32>
      tpu.vector_store %arg5[%c0_14, %c0_15], %35 {strides = array<i32>} : memref<8x128xf32, #tpu.memory_space<vmem>>, vector<8x128xf32>,
    } else {
    }
    %c0 = arith.constant 0 : index
    %c0_1 = arith.constant 0 : index
    %3 = vector.load %arg2[%c0, %c0_1] : memref<16x128xf32, #tpu.memory_space<vmem>>, vector<16x128xf32>
    %c0_2 = arith.constant 0 : index
    %c0_3 = arith.constant 0 : index
    %4 = vector.load %arg3[%c0_2, %c0_3] : memref<16x128xf32, #tpu.memory_space<vmem>>, vector<16x128xf32>
    %cst = arith.constant 0.000000e+00 : f32
    %5 = vector.broadcast %cst : f32 to vector<16x128xf32>
    %6 = arith.maximumf %3, %5 : vector<16x128xf32>
    %7 = arith.mulf %3, %4 : vector<16x128xf32>
    %8 = arith.subf %6, %7 : vector<16x128xf32>
    %9 = math.absf %3 : vector<16x128xf32>
    %cst_4 = arith.constant 0.000000e+00 : f32
    %10 = vector.broadcast %cst_4 : f32 to vector<16x128xf32>
    %11 = arith.subf %10, %9 : vector<16x128xf32>
    %12 = math.exp %11 : vector<16x128xf32>
    %13 = math.log1p %12 : vector<16x128xf32>
    %14 = arith.addf %8, %13 : vector<16x128xf32>
    %cst_5 = arith.constant 0.000000e+00 : f32
    %15 = vector.broadcast %cst_5 : f32 to vector<16x128xf32>
    %16 = arith.subf %15, %14 : vector<16x128xf32>
    %17 = math.exp %16 : vector<16x128xf32>
    %cst_6 = arith.constant 1.000000e+00 : f32
    %18 = vector.broadcast %cst_6 : f32 to vector<16x128xf32>
    %19 = arith.subf %18, %17 : vector<16x128xf32>
    %20 = arith.mulf %19, %19 : vector<16x128xf32>
    %21 = arith.mulf %20, %14 : vector<16x128xf32>
    %c1_i32 = arith.constant 1 : i32
    %22 = arith.muli %arg0, %c1_i32 : i32
    %23 = arith.addi %22, %arg1 : i32
    %c16_i32 = arith.constant 16 : i32
    %24 = arith.muli %23, %c16_i32 : i32
    %c16_i32_7 = arith.constant 16 : i32
    %25 = arith.addi %24, %c16_i32_7 : i32
    %c16_i32_8 = arith.constant 16 : i32
    %26 = arith.cmpi sle, %25, %c16_i32_8 : i32
    %27 = arith.extui %26 : i1 to i32
    %c0_i32_9 = arith.constant 0 : i32
    %28 = arith.cmpi ne, %27, %c0_i32_9 : i32
    scf.if %28 {
      %c0_13 = arith.constant 0 : index
      %c0_14 = arith.constant 0 : index
      %35 = vector.load %arg5[%c0_13, %c0_14] : memref<8x128xf32, #tpu.memory_space<vmem>>, vector<8x128xf32>
      %36 = vector.shape_cast %21 : vector<16x128xf32> to vector<2x8x128xf32>
      %cst_15 = arith.constant dense<0.000000e+00> : vector<8x128xf32>
      %37 = vector.multi_reduction <add>, %36, %cst_15 [0] : vector<2x8x128xf32> to vector<8x128xf32>
      %38 = arith.addf %35, %37 : vector<8x128xf32>
      %c0_16 = arith.constant 0 : index
      %c0_17 = arith.constant 0 : index
      %39 = vector.load %arg5[%c0_16, %c0_17] : memref<8x128xf32, #tpu.memory_space<vmem>>, vector<8x128xf32>
      tpu.vector_store %arg5[%c0_16, %c0_17], %38 {strides = array<i32>} : memref<8x128xf32, #tpu.memory_space<vmem>>, vector<8x128xf32>,
    } else {
    }
    %true = arith.constant true
    %29 = arith.xori %26, %true : i1
    %30 = arith.extui %29 : i1 to i32
    %c0_i32_10 = arith.constant 0 : i32
    %31 = arith.cmpi ne, %30, %c0_i32_10 : i32
    scf.if %31 {
      %35 = tpu.iota {dimensions = array<i32: 0>} : vector<16x128xi32>
      %36 = vector.broadcast %24 : i32 to vector<16x128xi32>
      %37 = arith.addi %36, %35 : vector<16x128xi32>
      %c16_i32_13 = arith.constant 16 : i32
      %38 = vector.broadcast %c16_i32_13 : i32 to vector<16x128xi32>
      %39 = arith.cmpi slt, %37, %38 : vector<16x128xi32>
      %cst_14 = arith.constant 0.000000e+00 : f32
      %40 = vector.broadcast %cst_14 : f32 to vector<16x128xf32>
      %41 = arith.select %39, %21, %40 : vector<16x128xi1>, vector<16x128xf32>
      %c0_15 = arith.constant 0 : index
      %c0_16 = arith.constant 0 : index
      %42 = vector.load %arg5[%c0_15, %c0_16] : memref<8x128xf32, #tpu.memory_space<vmem>>, vector<8x128xf32>
      %43 = vector.shape_cast %41 : vector<16x128xf32> to vector<2x8x128xf32>
      %cst_17 = arith.constant dense<0.000000e+00> : vector<8x128xf32>
      %44 = vector.multi_reduction <add>, %43, %cst_17 [0] : vector<2x8x128xf32> to vector<8x128xf32>
      %45 = arith.addf %42, %44 : vector<8x128xf32>
      %c0_18 = arith.constant 0 : index
      %c0_19 = arith.constant 0 : index
      %46 = vector.load %arg5[%c0_18, %c0_19] : memref<8x128xf32, #tpu.memory_space<vmem>>, vector<8x128xf32>
      tpu.vector_store %arg5[%c0_18, %c0_19], %45 {strides = array<i32>} : memref<8x128xf32, #tpu.memory_space<vmem>>, vector<8x128xf32>,
    } else {
    }
    %c0_i32_11 = arith.constant 0 : i32
    %32 = arith.cmpi eq, %arg1, %c0_i32_11 : i32
    %33 = arith.extui %32 : i1 to i32
    %c0_i32_12 = arith.constant 0 : i32
    %34 = arith.cmpi ne, %33, %c0_i32_12 : i32
    scf.if %34 {
      %c0_13 = arith.constant 0 : index
      %c0_14 = arith.constant 0 : index
      %35 = vector.load %arg5[%c0_13, %c0_14] : memref<8x128xf32, #tpu.memory_space<vmem>>, vector<8x128xf32>
      %c0_15 = arith.constant 0 : index
      %c0_16 = arith.constant 0 : index
      %36 = vector.load %arg4[%c0_15, %c0_16] : memref<8x128xf32, #tpu.memory_space<vmem>>, vector<8x128xf32>
      tpu.vector_store %arg4[%c0_15, %c0_16], %35 {strides = array<i32>} : memref<8x128xf32, #tpu.memory_space<vmem>>, vector<8x128xf32>,
    } else {
    }
    return
  }
  func.func @transform_0(%arg0: i32, %arg1: i32) -> (i32, i32) {
    %c1_i32 = arith.constant 1 : i32
    %0 = arith.muli %arg0, %c1_i32 : i32
    %1 = arith.addi %0, %arg1 : i32
    %c0_i32 = arith.constant 0 : i32
    %2 = arith.minsi %1, %c0_i32 : i32
    %c0_i32_0 = arith.constant 0 : i32
    %c0_i32_1 = arith.constant 0 : i32
    return %2, %c0_i32_0 : i32, i32
  }
  func.func @transform_1(%arg0: i32, %arg1: i32) -> (i32, i32) {
    %c1_i32 = arith.constant 1 : i32
    %0 = arith.muli %arg0, %c1_i32 : i32
    %1 = arith.addi %0, %arg1 : i32
    %c0_i32 = arith.constant 0 : i32
    %2 = arith.minsi %1, %c0_i32 : i32
    %c0_i32_0 = arith.constant 0 : i32
    %c0_i32_1 = arith.constant 0 : i32
    return %2, %c0_i32_0 : i32, i32
  }
  func.func @transform_2(%arg0: i32, %arg1: i32) -> (i32, i32) {
    %c0_i32 = arith.constant 0 : i32
    %c0_i32_0 = arith.constant 0 : i32
    return %arg0, %c0_i32 : i32, i32
  }
}

</mosaic_0001>

<bundles_post_ra>
// kernel: tpu_custom_call.1
= control target key start
LH: loop header
LB: loop body
LE: loop exit
PB: predicated region body
PF: predicated region fallthrough
CT: control target
= control target key end

     0   :  { %7 = vsyncpa [#allocation4], 0  ;;  %s314_s0 = inlined_call_operand.hbm [shape: f32[16,128], index: 0, kind: input, shape index: {}]   ;;  %s315_s1 = inlined_call_operand.hbm [shape: f32[16,128], index: 1, kind: input, shape index: {}]   ;;  %s316_s2 = inlined_call_operand.hbm [shape: f32[8,128], index: 2, kind: output, shape index: {}]  }
   0x1   :  { %8 = vsyncpa [#allocation7], 0 }
   0x2   :  { %9 = vsyncpa [#allocation5], 0  ;;  %s258_s9 = smov [#allocation3]   ;;  %s186_s13 = scalar_lea.hbm %s314_s0, 256 }
   0x3   :  { %s21_s10 = sshll.u32 %s258_s9, 4  ;;  %p187_p0 = scmp.ne.s32.totalorder %s314_s0, %s186_s13  ;;  %s22_s10 = int_to_ptr.vmem [resolvable:$true] %s21_s10 }
   0x4   :  { %p190_p1 = scmp.lt.u32.totalorder %s186_s13, %s314_s0 }
   0x6   :  { %p192_p2 = pnand %p190_p1, %p187_p0 }
   0x8   :  { %195 = shalt.err (!%p192_p2)
}
   0x9   :  { %s196_s18 = scalar_lea.vmem %s22_s10, 256  ;;  %p201_p4 = scmp.lt.s32.totalorder %s22_s10, %s22_s10 }
   0xa   :  { %p197_p3 = scmp.ne.s32.totalorder %s22_s10, %s196_s18  ;;  %p202_p5 = scmp.lt.s32.totalorder %s196_s18, %s196_s18 }
   0xc   :  { %p203_p6 = por %p202_p5, %p201_p4 }
   0xe   :  { %p204_p7 = pnand %p203_p6, %p197_p3 }
  0x10   :  { %207 = shalt.err (!%p204_p7)
}
  0x11   :  { %s259_s19 = smov 128   ;;  %s260_s20 = smov 8  }
  0x12   :  { %27 = dma.hbm_to_vmem [thread:$0]  %s314_s0, 256, %s22_s10, [#allocation4], %s259_s19, %s259_s19, %s260_s20  }
  0x13   :  { %s261_s23 = smov [#allocation6]   ;;  %s208_s27 = scalar_lea.hbm %s315_s1, 256 }
  0x14   :  { %s39_s24 = sshll.u32 %s261_s23, 4  ;;  %p209_p8 = scmp.ne.s32.totalorder %s315_s1, %s208_s27  ;;  %s40_s24 = int_to_ptr.vmem [resolvable:$true] %s39_s24 }
  0x15   :  { %p212_p9 = scmp.lt.u32.totalorder %s208_s27, %s315_s1 }
  0x17   :  { %p214_p10 = pnand %p212_p9, %p209_p8 }
  0x19   :  { %217 = shalt.err (!%p214_p10)
}
  0x1a   :  { %s218_s4 = scalar_lea.vmem %s40_s24, 256  ;;  %p223_p12 = scmp.lt.s32.totalorder %s40_s24, %s40_s24 }
  0x1b   :  { %p219_p11 = scmp.ne.s32.totalorder %s40_s24, %s218_s4  ;;  %p224_p13 = scmp.lt.s32.totalorder %s218_s4, %s218_s4 }
  0x1d   :  { %p225_p0 = por %p224_p13, %p223_p12 }
  0x1f   :  { %p226_p1 = pnand %p225_p0, %p219_p11 }
  0x21   :  { %229 = shalt.err (!%p226_p1)
}
  0x22   :  { %45 = dma.hbm_to_vmem [thread:$0]  %s315_s1, 256, %s40_s24, [#allocation7], %s259_s19, %s259_s19, %s260_s20  }
  0x23   :  { %252 = dma.done.wait [#allocation4], 256  }
  0x24   :  { %253 = vsyncadd [#allocation4], 4294967040 }
  0x25   :  { %254 = dma.done.wait [#allocation7], 256  }
  0x26   :  { %255 = vsyncadd [#allocation7], 4294967040  ;;  %v65_v0 = vld [vmem:[#allocation3] sm:$0xff]  ;;  %v66_v1 = vld [vmem:[#allocation3 + $0x8] sm:$0xff]  ;;  %s262_s1 = smov [#allocation8]  }
  0x27   :  { %v75_v2 = vand.u32 2147483647, %v65_v0  ;;  %v76_v3 = vand.u32 2147483647, %v66_v1  ;;  %v67_v14 = vld [vmem:[#allocation6] sm:$0xff]  ;;  %v68_v15 = vld [vmem:[#allocation6 + $0x8] sm:$0xff] }
  0x28   :  { %v69_v17 = vmax.f32 %v65_v0, 0.0  ;;  %v71_v18 = vmul.f32 %v67_v14, %v65_v0  ;;  %v70_v21 = vmax.f32 %v66_v1, 0.0  ;;  %v72_v22 = vmul.f32 %v68_v15, %v66_v1  ;;  %s155_s6 = sshll.u32 %s262_s1, 4  ;;  %s156_s6 = int_to_ptr.vmem [resolvable:$true] %s155_s6 }
  0x29   :  { %v77_v4 = vsub.f32 0.0, %v75_v2  ;;  %v78_v5 = vsub.f32 0.0, %v76_v3  ;;  %s230_s7 = scalar_lea.vmem %s156_s6, 128  ;;  %p235_p3 = scmp.lt.s32.totalorder %s156_s6, %s156_s6 }
  0x2a   :  { %v73_v26 = vsub.f32 %v69_v17, %v71_v18  ;;  %v74_v29 = vsub.f32 %v70_v21, %v72_v22  ;;  %p231_p2 = scmp.ne.s32.totalorder %s156_s6, %s230_s7  ;;  %p236_p4 = scmp.lt.s32.totalorder %s230_s7, %s230_s7 }
  0x2b   :  { %v79_v6 = vmul.f32 1.442695, %v77_v4  ;;  %v81_v7 = vmul.f32 1.442695, %v78_v5 }
  0x2c   :  { %p237_p5 = por %p236_p4, %p235_p3 }
  0x2d   :  { %174 = vpow2.f32 %v79_v6 }
  0x2e   :  { %176 = vpow2.f32 %v81_v7  ;;  %p238_p6 = pnand %p237_p5, %p231_p2 }
  0x37   :  { %v175_v8 = vpop.eup %174 }
  0x38   :  { %v177_v9 = vpop.eup %176  ;;  %v83_v10 = vadd.f32 1.0, %v175_v8  ;;  %v86_v12 = vmul.f32 -0.5, %v175_v8  ;;  %v89_v19 = vand.u32 2147483647, %v175_v8 }
  0x39   :  { %v92_v11 = vadd.f32 1.0, %v177_v9  ;;  %v95_v13 = vmul.f32 -0.5, %v177_v9  ;;  %v98_v23 = vand.u32 2147483647, %v177_v9 }
  0x3a   :  { %178 = vlog2.f32 %v83_v10  ;;  %v87_v16 = vadd.f32 1.0, %v86_v12  ;;  %vm90_vm0 = vcmp.lt.f32.partialorder %v89_v19, 0.0004427343 }
  0x3b   :  { %180 = vlog2.f32 %v92_v11  ;;  %v96_v20 = vadd.f32 1.0, %v95_v13  ;;  %vm99_vm1 = vcmp.lt.f32.partialorder %v98_v23, 0.0004427343 }
  0x3c   :  { %v88_v24 = vmul.f32 %v175_v8, %v87_v16 }
  0x3d   :  { %v97_v27 = vmul.f32 %v177_v9, %v96_v20 }
  0x44   :  { %v179_v25 = vpop.eup %178 }
  0x45   :  { %v181_v28 = vpop.eup %180  ;;  %v85_v30 = vmul.f32 0.6931472, %v179_v25 }
  0x46   :  { %v94_v31 = vmul.f32 0.6931472, %v181_v28 }
  0x47   :  { %v91_v32 = vsel %vm90_vm0, %v88_v24, %v85_v30 }
  0x48   :  { %v100_v33 = vsel %vm99_vm1, %v97_v27, %v94_v31  ;;  %v101_v34 = vadd.f32 %v91_v32, %v73_v26 }
  0x49   :  { %v102_v35 = vadd.f32 %v100_v33, %v74_v29 }
  0x4a   :  { %v103_v36 = vsub.f32 0.0, %v101_v34 }
  0x4b   :  { %v104_v37 = vsub.f32 0.0, %v102_v35 }
  0x4c   :  { %v105_v38 = vmul.f32 1.442695, %v103_v36 }
  0x4d   :  { %v107_v39 = vmul.f32 1.442695, %v104_v37 }
  0x4e   :  { %182 = vpow2.f32 %v105_v38 }
  0x4f   :  { %184 = vpow2.f32 %v107_v39 }
  0x58   :  { %v183_v40 = vpop.eup %182 }
  0x59   :  { %v185_v41 = vpop.eup %184  ;;  %v109_v42 = vsub.f32 1.0, %v183_v40 }
  0x5a   :  { %v110_v43 = vsub.f32 1.0, %v185_v41 }
  0x5b   :  { %v111_v44 = vmul.f32 %v109_v42, %v109_v42 }
  0x5c   :  { %v112_v45 = vmul.f32 %v110_v43, %v110_v43 }
  0x5d   :  { %v113_v46 = vmul.f32 %v111_v44, %v101_v34 }
  0x5e   :  { %v114_v47 = vmul.f32 %v112_v45, %v102_v35 }
  0x60   :  { %v123_v48 = vadd.f32 %v114_v47, %v113_v46 }
  0x62   :  { %148 = vst [vmem:[#allocation8] sm:$0xff] %v123_v48 }
  0x63   :  { %241 = shalt.err (!%p238_p6)
}
  0x64   :  { %s242_s10 = scalar_lea.hbm %s316_s2, 128 }
  0x65   :  { %p243_p7 = scmp.ne.s32.totalorder %s316_s2, %s242_s10  ;;  %p246_p8 = scmp.lt.u32.totalorder %s242_s10, %s316_s2 }
  0x67   :  { %p248_p9 = pnand %p246_p8, %p243_p7 }
  0x69   :  { %251 = shalt.err (!%p248_p9)
}
  0x6a   :  { %158 = dma.vmem_to_hbm [thread:$0]  %s156_s6, 128, %s316_s2, [#allocation5]  }
  0x6b   :  { %256 = dma.done.wait [#allocation5], 128  }
  0x6c   :  { %257 = vsyncadd [#allocation5], 4294967168 }
  0x6d   :  { %162 = vsyncpa [#allocation4], 1 }
  0x6e   :  { %163 = vsyncpa [#allocation7], 1 }
  0x6f   :  { %164 = vsyncpa [#allocation5], 1 }

</bundles_post_ra>
